<compile_context>
chip_gen: v7x
topology: tpu7x:2x2x1
jax: 0.10.0
libtpu: 0.0.40
codegen_flags: <defaults>
</compile_context>

<pallas_src>
import functools

import jax
import jax.numpy as jnp
from jax.experimental import pallas as pl
from jax.experimental.pallas import tpu as pltpu


def _round_up(x, m):
    return (x + m - 1) // m * m


def _device_kind():
    try:
        return jax.devices()[0].device_kind.lower()
    except Exception:
        return ""


def _num_tensorcores(kind):
    # v7x has 2 TensorCores per chip; v5e/v6e have 1.  Best-effort heuristic,
    # only affects the batch-tiling choice (never correctness).
    return 2 if "v7" in kind else 1


def _mlp_kernel(x_ref, w1_ref, b1_ref, w2_ref, b2_ref, w3_ref, b3_ref, o_ref):
    # All three matmuls + ReLUs fused; each grid step handles one batch tile.
    # Matmul inputs are cast to the weight dtype (f32 or bf16); accumulation
    # and bias adds stay in f32.
    cdt = w1_ref.dtype
    h1 = jnp.dot(x_ref[...].astype(cdt), w1_ref[...],
                 preferred_element_type=jnp.float32) + b1_ref[...]
    h1 = jnp.maximum(h1, 0.0)
    h2 = jnp.dot(h1.astype(cdt), w2_ref[...],
                 preferred_element_type=jnp.float32) + b2_ref[...]
    h2 = jnp.maximum(h2, 0.0)
    out = jnp.dot(h2.astype(cdt), w3_ref[...],
                  preferred_element_type=jnp.float32) + b3_ref[...]
    o_ref[...] = out.astype(o_ref.dtype)


@functools.partial(jax.jit, static_argnames=("block_m", "use_bf16"))
def prednet_mo_forward(x, params, *, block_m=None, use_bf16=False):
    """Fused forward pass for PredNetMO.

    x: (B, input_dim) float32
    params: dict with w1 (in,128), b1 (1,128), w2 (128,128), b2 (1,128),
            w3 (128,out), b3 (1,out). Weights stored as (in_features, out_features).
    """
    w1, b1 = params["w1"], params["b1"]
    w2, b2 = params["w2"], params["b2"]
    w3, b3 = params["w3"], params["b3"]

    B, in_dim = x.shape
    out_dim = w3.shape[1]

    kind = _device_kind()
    num_tc = _num_tensorcores(kind)

    if block_m is None:
        # v5e: 512x128 f32 intermediates pressure the single vst slot -> 256.
        block_m = 256 if ("v5 lite" in kind or "v5e" in kind or "v5lite" in kind) else 512

    # --- Batch tiling.
    #   single-TC (v5e/v6e): biggest tile that covers B (no pointless split).
    #   multi-TC  (v7x)    : cap tile so each core gets >=2 grid steps, which
    #                        restores per-core DMA/compute pipelining.
    if num_tc > 1 and B >= 32:
        bm = min(block_m, _round_up(pl.cdiv(B, 2 * num_tc), 8))
    else:
        bm = min(block_m, _round_up(B, 8))
    bm = max(bm, 8)

    grid = (pl.cdiv(B, bm),)

    if use_bf16:
        # bf16 MXU inputs, f32 accumulation; biases stay f32.
        x = x.astype(jnp.bfloat16)
        w1 = w1.astype(jnp.bfloat16)
        w2 = w2.astype(jnp.bfloat16)
        w3 = w3.astype(jnp.bfloat16)

    out = pl.pallas_call(
        _mlp_kernel,
        out_shape=jax.ShapeDtypeStruct((B, out_dim), jnp.float32),
        grid_spec=pltpu.PrefetchScalarGridSpec(
            num_scalar_prefetch=0,
            grid=grid,
            in_specs=[
                pl.BlockSpec((bm, in_dim), lambda i: (i, 0)),   # x batch tile
                pl.BlockSpec(w1.shape, lambda i: (0, 0)),       # weights resident
                pl.BlockSpec(b1.shape, lambda i: (0, 0)),
                pl.BlockSpec(w2.shape, lambda i: (0, 0)),
                pl.BlockSpec(b2.shape, lambda i: (0, 0)),
                pl.BlockSpec(w3.shape, lambda i: (0, 0)),
                pl.BlockSpec(b3.shape, lambda i: (0, 0)),
            ],
            # Narrow output: last block dim equals the full array dim, so no
            # lane padding and no wrapper-side slice copy is needed.
            out_specs=pl.BlockSpec((bm, out_dim), lambda i: (i, 0)),
        ),
        compiler_params=pltpu.CompilerParams(
            dimension_semantics=("parallel",),
        ),
    )(x, w1, b1, w2, b2, w3, b3)

    return out


def init_prednet_mo_params(key, input_dim, output_dim, hidden=128):
    """Deterministic init matching torch.nn.Linear default:
    U(-1/sqrt(fan_in), 1/sqrt(fan_in)) for both weights and biases.
    Weights stored as (in_features, out_features)."""
    keys = jax.random.split(key, 6)

    def linear(kw, kb, fan_in, fan_out):
        bound = 1.0 / jnp.sqrt(fan_in)
        w = jax.random.uniform(kw, (fan_in, fan_out), jnp.float32, -bound, bound)
        b = jax.random.uniform(kb, (1, fan_out), jnp.float32, -bound, bound)
        return w, b

    w1, b1 = linear(keys[0], keys[1], input_dim, hidden)
    w2, b2 = linear(keys[2], keys[3], hidden, hidden)
    w3, b3 = linear(keys[4], keys[5], hidden, output_dim)
    return {"w1": w1, "b1": b1, "w2": w2, "b2": b2, "w3": w3, "b3": b3}


def _reference_forward(x, p):
    h1 = jnp.maximum(x @ p["w1"] + p["b1"], 0.0)
    h2 = jnp.maximum(h1 @ p["w2"] + p["b2"], 0.0)
    return h2 @ p["w3"] + p["b3"]


if __name__ == "__main__":
    key = jax.random.PRNGKey(0)
    k_param, k_x = jax.random.split(key)

    batch, input_dim, output_dim = 16, 16, 8
    params = init_prednet_mo_params(k_param, input_dim, output_dim)
    x = jax.random.normal(k_x, (batch, input_dim), jnp.float32)

    # f32 path (default).
    out = jax.block_until_ready(prednet_mo_forward(x, params))
    ref = _reference_forward(x, params)
    assert out.shape == (batch, output_dim)
    assert jnp.allclose(out, ref, atol=1e-5, rtol=1e-5), "mismatch vs reference"

    # Ragged batch (not a multiple of 8 / of the tile) exercises the
    # masked-last-block path (no wrapper-side padding or slicing anymore).
    x2 = x[:13]
    out2 = jax.block_until_ready(prednet_mo_forward(x2, params))
    ref2 = _reference_forward(x2, params)
    assert out2.shape == (13, output_dim)
    assert jnp.allclose(out2, ref2, atol=1e-5, rtol=1e-5), "mismatch (ragged batch)"

    # Optional bf16-MXU path (flag-gated; loose tolerance vs the f32 reference).
    out3 = jax.block_until_ready(prednet_mo_forward(x, params, use_bf16=True))
    assert out3.shape == (batch, output_dim)
    assert jnp.allclose(out3, ref, atol=1e-1, rtol=1e-1), "mismatch (bf16 path)"

    print("KERNEL_OK")
</pallas_src>

<mosaic_0001>
module attributes {stable_mosaic.version = 11 : i64} {
  func.func @_mlp_kernel(%arg0: i32, %arg1: memref<16x16xf32, #tpu.memory_space<vmem>>, %arg2: memref<16x128xf32, #tpu.memory_space<vmem>>, %arg3: memref<1x128xf32, #tpu.memory_space<vmem>>, %arg4: memref<128x128xf32, #tpu.memory_space<vmem>>, %arg5: memref<1x128xf32, #tpu.memory_space<vmem>>, %arg6: memref<128x8xf32, #tpu.memory_space<vmem>>, %arg7: memref<1x8xf32, #tpu.memory_space<vmem>>, %arg8: memref<16x8xf32, #tpu.memory_space<vmem>>) attributes {dimension_semantics = [#tpu.dimension_semantics<parallel>], iteration_bounds = array<i64: 1>, scalar_prefetch = 0 : i64, scratch_operands = 0 : i64, tpu.core_type = #tpu.core_type<tc>, window_params = [{transform_indices = @transform_0, window_bounds = array<i64: 16, 16>}, {pipeline_mode = #tpu.pipeline_mode<synchronous>, transform_indices = @transform_1, window_bounds = array<i64: 16, 128>}, {pipeline_mode = #tpu.pipeline_mode<synchronous>, transform_indices = @transform_2, window_bounds = array<i64: 1, 128>}, {pipeline_mode = #tpu.pipeline_mode<synchronous>, transform_indices = @transform_3, window_bounds = array<i64: 128, 128>}, {pipeline_mode = #tpu.pipeline_mode<synchronous>, transform_indices = @transform_4, window_bounds = array<i64: 1, 128>}, {pipeline_mode = #tpu.pipeline_mode<synchronous>, transform_indices = @transform_5, window_bounds = array<i64: 128, 8>}, {pipeline_mode = #tpu.pipeline_mode<synchronous>, transform_indices = @transform_6, window_bounds = array<i64: 1, 8>}, {transform_indices = @transform_7, window_bounds = array<i64: 16, 8>}]} {
    %c0 = arith.constant 0 : index
    %c0_0 = arith.constant 0 : index
    %0 = vector.load %arg1[%c0, %c0_0] : memref<16x16xf32, #tpu.memory_space<vmem>>, vector<16x16xf32>
    %c0_1 = arith.constant 0 : index
    %c0_2 = arith.constant 0 : index
    %1 = vector.load %arg2[%c0_1, %c0_2] : memref<16x128xf32, #tpu.memory_space<vmem>>, vector<16x128xf32>
    %cst = arith.constant dense<0.000000e+00> : vector<16x128xf32>
    %2 = tpu.matmul %0, %1, %cst {dimension_numbers = #tpu.dot_dimension_numbers<[1], [0], [0], [1], [0, 0, 1, 1], [], []>} : vector<16x16xf32>, vector<16x128xf32>, vector<16x128xf32> -> vector<16x128xf32>
    %c0_3 = arith.constant 0 : index
    %c0_4 = arith.constant 0 : index
    %3 = vector.load %arg3[%c0_3, %c0_4] : memref<1x128xf32, #tpu.memory_space<vmem>>, vector<1x128xf32>
    %4 = vector.broadcast %3 : vector<1x128xf32> to vector<16x128xf32>
    %5 = arith.addf %2, %4 : vector<16x128xf32>
    %cst_5 = arith.constant 0.000000e+00 : f32
    %6 = vector.broadcast %cst_5 : f32 to vector<16x128xf32>
    %7 = arith.maximumf %5, %6 : vector<16x128xf32>
    %c0_6 = arith.constant 0 : index
    %c0_7 = arith.constant 0 : index
    %8 = vector.load %arg4[%c0_6, %c0_7] : memref<128x128xf32, #tpu.memory_space<vmem>>, vector<128x128xf32>
    %cst_8 = arith.constant dense<0.000000e+00> : vector<16x128xf32>
    %9 = tpu.matmul %7, %8, %cst_8 {dimension_numbers = #tpu.dot_dimension_numbers<[1], [0], [0], [1], [0, 0, 1, 1], [], []>} : vector<16x128xf32>, vector<128x128xf32>, vector<16x128xf32> -> vector<16x128xf32>
    %c0_9 = arith.constant 0 : index
    %c0_10 = arith.constant 0 : index
    %10 = vector.load %arg5[%c0_9, %c0_10] : memref<1x128xf32, #tpu.memory_space<vmem>>, vector<1x128xf32>
    %11 = vector.broadcast %10 : vector<1x128xf32> to vector<16x128xf32>
    %12 = arith.addf %9, %11 : vector<16x128xf32>
    %cst_11 = arith.constant 0.000000e+00 : f32
    %13 = vector.broadcast %cst_11 : f32 to vector<16x128xf32>
    %14 = arith.maximumf %12, %13 : vector<16x128xf32>
    %c0_12 = arith.constant 0 : index
    %c0_13 = arith.constant 0 : index
    %15 = vector.load %arg6[%c0_12, %c0_13] : memref<128x8xf32, #tpu.memory_space<vmem>>, vector<128x8xf32>
    %cst_14 = arith.constant dense<0.000000e+00> : vector<16x8xf32>
    %16 = tpu.matmul %14, %15, %cst_14 {dimension_numbers = #tpu.dot_dimension_numbers<[1], [0], [0], [1], [0, 0, 1, 1], [], []>} : vector<16x128xf32>, vector<128x8xf32>, vector<16x8xf32> -> vector<16x8xf32>
    %c0_15 = arith.constant 0 : index
    %c0_16 = arith.constant 0 : index
    %17 = vector.load %arg7[%c0_15, %c0_16] : memref<1x8xf32, #tpu.memory_space<vmem>>, vector<1x8xf32>
    %18 = vector.broadcast %17 : vector<1x8xf32> to vector<16x8xf32>
    %19 = arith.addf %16, %18 : vector<16x8xf32>
    %c0_17 = arith.constant 0 : index
    %c0_18 = arith.constant 0 : index
    %20 = vector.load %arg8[%c0_17, %c0_18] : memref<16x8xf32, #tpu.memory_space<vmem>>, vector<16x8xf32>
    tpu.vector_store %arg8[%c0_17, %c0_18], %19 {strides = array<i32>} : memref<16x8xf32, #tpu.memory_space<vmem>>, vector<16x8xf32>,
    return
  }
  func.func @transform_0(%arg0: i32) -> (i32, i32) {
    %c0_i32 = arith.constant 0 : i32
    %c0_i32_0 = arith.constant 0 : i32
    return %arg0, %c0_i32 : i32, i32
  }
  func.func @transform_1(%arg0: i32) -> (i32, i32) {
    %c0_i32 = arith.constant 0 : i32
    %c0_i32_0 = arith.constant 0 : i32
    %c0_i32_1 = arith.constant 0 : i32
    return %c0_i32, %c0_i32_0 : i32, i32
  }
  func.func @transform_2(%arg0: i32) -> (i32, i32) {
    %c0_i32 = arith.constant 0 : i32
    %c0_i32_0 = arith.constant 0 : i32
    %c0_i32_1 = arith.constant 0 : i32
    return %c0_i32, %c0_i32_0 : i32, i32
  }
  func.func @transform_3(%arg0: i32) -> (i32, i32) {
    %c0_i32 = arith.constant 0 : i32
    %c0_i32_0 = arith.constant 0 : i32
    %c0_i32_1 = arith.constant 0 : i32
    return %c0_i32, %c0_i32_0 : i32, i32
  }
  func.func @transform_4(%arg0: i32) -> (i32, i32) {
    %c0_i32 = arith.constant 0 : i32
    %c0_i32_0 = arith.constant 0 : i32
    %c0_i32_1 = arith.constant 0 : i32
    return %c0_i32, %c0_i32_0 : i32, i32
  }
  func.func @transform_5(%arg0: i32) -> (i32, i32) {
    %c0_i32 = arith.constant 0 : i32
    %c0_i32_0 = arith.constant 0 : i32
    %c0_i32_1 = arith.constant 0 : i32
    return %c0_i32, %c0_i32_0 : i32, i32
  }
  func.func @transform_6(%arg0: i32) -> (i32, i32) {
    %c0_i32 = arith.constant 0 : i32
    %c0_i32_0 = arith.constant 0 : i32
    %c0_i32_1 = arith.constant 0 : i32
    return %c0_i32, %c0_i32_0 : i32, i32
  }
  func.func @transform_7(%arg0: i32) -> (i32, i32) {
    %c0_i32 = arith.constant 0 : i32
    %c0_i32_0 = arith.constant 0 : i32
    return %arg0, %c0_i32 : i32, i32
  }
}

</mosaic_0001>

<bundles_post_ra>
// kernel: prednet_mo_forward.1
= control target key start
LH: loop header
LB: loop body
LE: loop exit
PB: predicated region body
PF: predicated region fallthrough
CT: control target
= control target key end

     0   :  { %12 = vsyncpa [#allocation3], 0  ;;  %s558_s24 = smov [#allocation2]   ;;  %s732_s0 = inlined_call_operand.vmem [shape: f32[16,16], index: 0, kind: input, shape index: {}]   ;;  %s733_s1 = inlined_call_operand.hbm [shape: f32[16,128], index: 1, kind: input, shape index: {}]   ;;  %s734_s2 = inlined_call_operand.vmem [shape: f32[1,128], index: 2, kind: input, shape index: {}]   ;;  %s735_s3 = inlined_call_operand.vmem [shape: f32[128,128], index: 3, kind: input, shape index: {}]   ;;  %s736_s4 = inlined_call_operand.vmem [shape: f32[1,128], index: 4, kind: input, shape index: {}]   ;;  %s737_s5 = inlined_call_operand.vmem [shape: f32[128,8], index: 5, kind: input, shape index: {}]   ;;  %s738_s6 = inlined_call_operand.vmem [shape: f32[1,8], index: 6, kind: input, shape index: {}]   ;;  %s739_s7 = inlined_call_operand.vmem [shape: f32[16,8], index: 7, kind: output, shape index: {}]  }
   0x1   :  { %s20_s25 = sshll.u32 %s558_s24, 4  ;;  %s534_s28 = scalar_lea.hbm %s733_s1, 256  ;;  %s21_s25 = int_to_ptr.vmem [resolvable:$true] %s20_s25 }
   0x2   :  { %p535_p0 = scmp.ne.s32.totalorder %s733_s1, %s534_s28  ;;  %p538_p1 = scmp.lt.u32.totalorder %s534_s28, %s733_s1 }
   0x4   :  { %p540_p2 = pnand %p538_p1, %p535_p0 }
   0x6   :  { %543 = shalt.err (!%p540_p2)
}
   0x7   :  { %s544_s10 = scalar_lea.vmem %s21_s25, 256  ;;  %p549_p4 = scmp.lt.s32.totalorder %s21_s25, %s21_s25 }
   0x8   :  { %p545_p3 = scmp.ne.s32.totalorder %s21_s25, %s544_s10  ;;  %p550_p5 = scmp.lt.s32.totalorder %s544_s10, %s544_s10 }
   0xa   :  { %p551_p6 = por %p550_p5, %p549_p4 }
   0xc   :  { %p552_p7 = pnand %p551_p6, %p545_p3 }
   0xe   :  { %555 = shalt.err (!%p552_p7)
}
   0xf   :  { %s559_s11 = smov 128   ;;  %s560_s12 = smov 8  }
  0x10   :  { %26 = dma.hbm_to_vmem [thread:$0]  %s733_s1, 256, %s21_s25, [#allocation3], %s559_s11, %s559_s11, %s560_s12  }
  0x11   :  { %556 = dma.done.wait [#allocation3], 256  }
  0x12   :  { %557 = vsyncadd [#allocation3], 4294967040  ;;  %vm51_vm0 = vcmask 130048   ;;  %v42_v0 = vld [vmem:[#allocation2] sm:$0xff]  ;;  %v43_v1 = vld [vmem:[#allocation2 + $0x8] sm:$0xff]  ;;  %vm333_vm1 = vcmask 64512  }
  0x13   :  { %v40_v2 = vld [vmem:[%s732_s0] sm:$0xff]  ;;  %v463_v3 = vpack.c.bf16 %v43_v1, %v42_v0  ;;  %v136_v5 = vld [vmem:[%s735_s3 + $0x8] sm:$0xff]  ;;  %v137_v7 = vld [vmem:[%s735_s3 + $0x10] sm:$0xff] }
  0x14   :  { %390 = vmatprep.mubr.msk.f32.mxu0 %vm51_vm0, %v40_v2  ;;  %v135_v4 = vld [vmem:[%s735_s3] sm:$0xff]  ;;  %v138_v8 = vld [vmem:[%s735_s3 + $0x18] sm:$0xff]  ;;  %v140_v11 = vld [vmem:[%s735_s3 + $0x28] sm:$0xff] }
  0x15   :  { %v467_v6 = vpack.c.bf16 %v136_v5, %v135_v4  ;;  %464 = vmatprep.subr.bf16.mxu0 %v463_v3  ;;  %v471_v9 = vpack.c.bf16 %v138_v8, %v137_v7  ;;  %v139_v10 = vld [vmem:[%s735_s3 + $0x20] sm:$0xff]  ;;  %v41_v12 = vld [vmem:[%s732_s0 + $0x8] sm:$0xff]  ;;  %v141_v14 = vld [vmem:[%s735_s3 + $0x30] sm:$0xff] }
  0x16   :  { %466 = vmatpush3.bf16.msra.mxu0 %v463_v3  ;;  %v475_v13 = vpack.c.bf16 %v140_v11, %v139_v10  ;;  %v142_v15 = vld [vmem:[%s735_s3 + $0x38] sm:$0xff]  ;;  %v143_v17 = vld [vmem:[%s735_s3 + $0x40] sm:$0xff]  ;;  %v144_v18 = vld [vmem:[%s735_s3 + $0x48] sm:$0xff] }
  0x17   :  { %468 = vmatprep.subr.bf16.mxu1 %v467_v6  ;;  %v479_v16 = vpack.c.bf16 %v142_v15, %v141_v14  ;;  %v483_v19 = vpack.c.bf16 %v144_v18, %v143_v17  ;;  %v145_v20 = vld [vmem:[%s735_s3 + $0x50] sm:$0xff]  ;;  %v146_v21 = vld [vmem:[%s735_s3 + $0x58] sm:$0xff]  ;;  %v147_v23 = vld [vmem:[%s735_s3 + $0x60] sm:$0xff] }
  0x18   :  { %470 = vmatpush3.bf16.msra.mxu1 %v467_v6  ;;  %v487_v22 = vpack.c.bf16 %v146_v21, %v145_v20  ;;  %v148_v24 = vld [vmem:[%s735_s3 + $0x68] sm:$0xff]  ;;  %v149_v26 = vld [vmem:[%s735_s3 + $0x70] sm:$0xff]  ;;  %v150_v27 = vld [vmem:[%s735_s3 + $0x78] sm:$0xff] }
  0x19   :  { %472 = vmatprep.subr.bf16.mxu1 %v471_v9  ;;  %391 = vmatmul.mubr.msk.f32.vlgmr.msra.gmra.mrb[0].mxu0 %vm51_vm0, %v41_v12  ;;  %v491_v25 = vpack.c.bf16 %v148_v24, %v147_v23  ;;  %v495_v28 = vpack.c.bf16 %v150_v27, %v149_v26  ;;  %v235_v29 = vld [vmem:[%s737_s5] sm:$0xff]  ;;  %v236_v30 = vld [vmem:[%s737_s5 + $0x8] sm:$0xff]  ;;  %v237_v31 = vld [vmem:[%s737_s5 + $0x10] sm:$0xff] }
  0x1a   :  { %v499_v32 = vpack.c.bf16 %v236_v30, %v235_v29  ;;  %v238_v33 = vld [vmem:[%s737_s5 + $0x18] sm:$0xff]  ;;  %v239_v35 = vld [vmem:[%s737_s5 + $0x20] sm:$0xff]  ;;  %v240_v36 = vld [vmem:[%s737_s5 + $0x28] sm:$0xff] }
  0x1b   :  { %v503_v34 = vpack.c.bf16 %v238_v33, %v237_v31  ;;  %v507_v37 = vpack.c.bf16 %v240_v36, %v239_v35  ;;  %v241_v38 = vld [vmem:[%s737_s5 + $0x30] sm:$0xff]  ;;  %v242_v39 = vld [vmem:[%s737_s5 + $0x38] sm:$0xff]  ;;  %v243_v41 = vld [vmem:[%s737_s5 + $0x40] sm:$0xff] }
  0x1c   :  { %474 = vmatpush3.bf16.msra.mxu1 %v471_v9  ;;  %500 = vmatprep.subr.bf16.mxu0 %v499_v32  ;;  %v511_v40 = vpack.c.bf16 %v242_v39, %v241_v38  ;;  %v244_v42 = vld [vmem:[%s737_s5 + $0x48] sm:$0xff]  ;;  %v245_v44 = vld [vmem:[%s737_s5 + $0x50] sm:$0xff]  ;;  %v246_v45 = vld [vmem:[%s737_s5 + $0x58] sm:$0xff] }
  0x1d   :  { %476 = vmatprep.subr.bf16.mxu1 %v475_v13  ;;  %502 = vmatpush3.bf16.msra.mxu0 %v499_v32  ;;  %v515_v43 = vpack.c.bf16 %v244_v42, %v243_v41  ;;  %v519_v46 = vpack.c.bf16 %v246_v45, %v245_v44  ;;  %v247_v47 = vld [vmem:[%s737_s5 + $0x60] sm:$0xff]  ;;  %v248_v48 = vld [vmem:[%s737_s5 + $0x68] sm:$0xff]  ;;  %v249_v57 = vld [vmem:[%s737_s5 + $0x70] sm:$0xff] }
  0x1e   :  { %504 = vmatprep.subr.bf16.mxu0 %v503_v34  ;;  %v523_v49 = vpack.c.bf16 %v248_v48, %v247_v47  ;;  %v341_v50 = vld [vmem:[%s734_s2] ss:$0 sm:$0xff]  ;;  %v250_v58 = vld [vmem:[%s737_s5 + $0x78] sm:$0xff] }
  0x1f   :  { %v527_v59 = vpack.c.bf16 %v250_v58, %v249_v57  ;;  %v344_v60 = vld [vmem:[%s736_s4] ss:$0 sm:$0xff] }
  0x20   :  { %478 = vmatpush3.bf16.msra.mxu1 %v475_v13  ;;  %v345_v3 = vld [vmem:[%s738_s6] ss:$0 sm:$0xff] }
  0x21   :  { %480 = vmatprep.subr.bf16.mxu1 %v479_v16  ;;  %506 = vmatpush3.bf16.msra.mxu0 %v503_v34 }
  0x22   :  { %508 = vmatprep.subr.bf16.mxu0 %v507_v37 }
  0x24   :  { %482 = vmatpush3.bf16.msra.mxu1 %v479_v16 }
  0x25   :  { %484 = vmatprep.subr.bf16.mxu1 %v483_v19  ;;  %510 = vmatpush3.bf16.msra.mxu0 %v507_v37 }
  0x26   :  { %512 = vmatprep.subr.bf16.mxu0 %v511_v40 }
  0x28   :  { %486 = vmatpush3.bf16.msra.mxu1 %v483_v19 }
  0x29   :  { %488 = vmatprep.subr.bf16.mxu1 %v487_v22  ;;  %514 = vmatpush3.bf16.msra.mxu0 %v511_v40 }
  0x2a   :  { %516 = vmatprep.subr.bf16.mxu0 %v515_v43 }
  0x2c   :  { %490 = vmatpush3.bf16.msra.mxu1 %v487_v22 }
  0x2d   :  { %492 = vmatprep.subr.bf16.mxu1 %v491_v25  ;;  %518 = vmatpush3.bf16.msra.mxu0 %v515_v43 }
  0x2e   :  { %520 = vmatprep.subr.bf16.mxu0 %v519_v46 }
  0x30   :  { %494 = vmatpush3.bf16.msra.mxu1 %v491_v25 }
  0x31   :  { %496 = vmatprep.subr.bf16.mxu1 %v495_v28  ;;  %522 = vmatpush3.bf16.msra.mxu0 %v519_v46 }
  0x32   :  { %524 = vmatprep.subr.bf16.mxu0 %v523_v49 }
  0x34   :  { %498 = vmatpush3.bf16.msra.mxu1 %v495_v28 }
  0x35   :  { %526 = vmatpush3.bf16.msra.mxu0 %v523_v49 }
  0x36   :  { %528 = vmatprep.subr.bf16.mxu0 %v527_v59 }
  0x39   :  { %530 = vmatpush3.bf16.msra.mxu0 %v527_v59 }
  0xec   :  { %v392_v51 = vpop.f32.mrb[0].mxu0 }
  0xed   :  { %v130_v52 = vadd.f32 %v392_v51, %v341_v50  ;;  %v124_v53 = vpop.f32.mrb[1].mxu0 }
  0xee   :  { %v125_v54 = vadd.f32 %v341_v50, %v124_v53 }
  0xef   :  { %v134_v56 = vmax.f32 %v130_v52, 0.0 }
  0xf0   :  { %v133_v55 = vmax.f32 %v125_v54, 0.0 }
  0xf2   :  { %425 = vmatprep.mubr.f32.mxu1 %v133_v55 }
  0xf3   :  { %426 = vmatmul.mubr.f32.vlgmr.msra.gmra.mrb[0].mxu1 %v134_v56 }
 0x1c6   :  { %v427_v61 = vpop.f32.mrb[0].mxu1 }
 0x1c7   :  { %v230_v62 = vadd.f32 %v427_v61, %v344_v60  ;;  %v224_v63 = vpop.f32.mrb[1].mxu1 }
 0x1c8   :  { %v225_v0 = vadd.f32 %v344_v60, %v224_v63 }
 0x1c9   :  { %v234_v2 = vmax.f32 %v230_v62, 0.0 }
 0x1ca   :  { %v233_v1 = vmax.f32 %v225_v0, 0.0 }
 0x1cc   :  { %460 = vmatprep.mubr.f32.mxu0 %v233_v1 }
 0x1cd   :  { %461 = vmatmul.mubr.f32.vlgmr.msra.gmra.mrb[2].mxu0 %v234_v2 }
 0x2a0   :  { %v462_v4 = vpop.f32.mrb[2].mxu0 }
 0x2a1   :  { %v330_v5 = vadd.f32 %v462_v4, %v345_v3  ;;  %v324_v6 = vpop.f32.mrb[3].mxu0 }
 0x2a2   :  { %v325_v7 = vadd.f32 %v345_v3, %v324_v6 }
 0x2a3   :  { %335 = vst.msk [vmem:[%s739_s7 + $0x8] sm:$0xff] %vm333_vm1, %v330_v5 }
 0x2a4   :  { %334 = vst.msk [vmem:[%s739_s7] sm:$0xff] %vm333_vm1, %v325_v7 }
 0x2a5   :  { %340 = vsyncpa [#allocation3], 1 }

</bundles_post_ra>
